<compile_context>
chip_gen: v5e
topology: v5e:2x2
jax: 0.10.0
libtpu: 0.0.40
codegen_flags: <defaults>
</compile_context>

<pallas_src>
import jax
import jax.numpy as jnp
from jax.experimental import pallas as pl
from jax.experimental.pallas import tpu as pltpu

BN_EPS = 1e-5


# ----------------------------- Pallas kernel ---------------------------------

def _convface_mlp_kernel(s_ref, w_ref, b_ref, o_ref):
    # s_ref : (C_in, Ft)   summed center+neighbor features, faces on the lane axis
    # w_ref : (C_out, C_in) BN-folded 1x1 Conv1d weight (VMEM-resident across grid)
    # b_ref : (C_out, 1)    BN-folded bias
    y = jnp.dot(w_ref[...], s_ref[...], preferred_element_type=jnp.float32)
    o_ref[...] = jnp.maximum(y + b_ref[...], 0.0).astype(o_ref.dtype)


def _convface_mlp(s, w_folded, b_folded, *, f_tile=1024):
    """s: [M, C_in, Fp] -> relu(W' @ s + b') : [M, C_out, Fp] (Pallas, faces tiled)."""
    M, C_in, Fp = s.shape
    C_out = w_folded.shape[0]

    # Fold M into the face/lane axis so every block is lane-dense and >=128 wide.
    s2 = jnp.transpose(s, (1, 0, 2)).reshape(C_in, M * Fp)
    L = M * Fp
    Lp = ((L + 127) // 128) * 128
    if Lp != L:
        s2 = jnp.pad(s2, ((0, 0), (0, Lp - L)))

    # Lane-aligned face tile (multiple of 128).  Small enough to double-buffer
    # comfortably inside v7x's 64 MiB VMEM even for the C_in=128 second layer.
    tile = max(128, (min(f_tile, Lp) // 128) * 128)
    grid = (pl.cdiv(Lp, tile),)

    out2 = pl.pallas_call(
        _convface_mlp_kernel,
        out_shape=jax.ShapeDtypeStruct((C_out, Lp), jnp.float32),
        grid_spec=pltpu.PrefetchScalarGridSpec(
            num_scalar_prefetch=0,
            grid=grid,
            in_specs=[
                pl.BlockSpec((C_in, tile), lambda i: (0, i)),
                pl.BlockSpec((C_out, C_in), lambda i: (0, 0)),   # stays VMEM-resident
                pl.BlockSpec((C_out, 1), lambda i: (0, 0)),
            ],
            out_specs=pl.BlockSpec((C_out, tile), lambda i: (0, i)),
        ),
        compiler_params=pltpu.CompilerParams(
            dimension_semantics=("parallel",),          # shards across TCs on v7x
            vmem_limit_bytes=48 * 1024 * 1024),
    )(s2, w_folded, b_folded[:, None])

    out2 = out2[:, :L].reshape(C_out, M, Fp)
    return jnp.transpose(out2, (1, 0, 2))               # [M, C_out, Fp]


# ----------------------------- JAX-side gather glue ---------------------------

def _neighbor_sum(fea, ring_n, valid=None):
    """sum_k fea[m, :, ring_n[m, p, k]] (optionally masked).  fea: [M,C,F], ring_n: [M,Fp,K]."""
    K = ring_n.shape[-1]
    acc = None
    for k in range(K):
        g = jax.vmap(lambda f, r: f[:, r])(fea, ring_n[:, :, k])      # [M, C, Fp]
        if valid is not None:
            g = g * valid[:, None, :, k].astype(fea.dtype)
        acc = g if acc is None else acc + g
    return acc


def _fold_bn(params):
    """Fold Conv1d bias + BatchNorm1d (eval) into a single weight/bias pair."""
    w, b, gamma, beta, rmean, rvar = params
    scale = gamma / jnp.sqrt(rvar + BN_EPS)
    w_f = w * scale[:, None]
    b_f = b * scale + (beta - rmean * scale)
    return w_f, b_f


# ----------------------------- ConvFace / ConvFaceBlock ----------------------

def conv_face(fea_full, ring_n, pool_idx, params, f_tile=1024):
    """Mirrors ConvFace.forward (neighbors gathered from the FULL face set)."""
    w_f, b_f = _fold_bn(params)
    nb_sum = _neighbor_sum(fea_full, ring_n)                          # [M, C, Fp]
    fea_pool = fea_full[:, :, pool_idx] if pool_idx is not None else fea_full
    s = fea_pool + nb_sum
    return _convface_mlp(s, w_f, b_f, f_tile=f_tile)


def conv_face_pooled(fea_pooled, ring_pooled, valid, params, f_tile=1024):
    """ConvFace where both centers and neighbors already live in pooled index space."""
    w_f, b_f = _fold_bn(params)
    nb_sum = _neighbor_sum(fea_pooled, ring_pooled, valid)            # [M, C, Fp]
    s = fea_pooled + nb_sum
    return _convface_mlp(s, w_f, b_f, f_tile=f_tile)


def conv_face_block(fea, ring_n, pool_idx, params1, params2, f_tile=1024):
    """Mirrors ConvFaceBlock.forward without round-tripping ph1 through HBM."""
    M, _, F_total = fea.shape
    out1 = conv_face(fea, ring_n, pool_idx, params1, f_tile)          # [M, 128, Fp]

    if pool_idx is not None:
        Fp = pool_idx.shape[0]
        # Remap ring_n into pooled-index space; neighbors not in the pooled set
        # would read zeros from the scattered placeholder -> mask them to 0.
        inv = jnp.full((F_total,), -1, jnp.int32).at[pool_idx].set(
            jnp.arange(Fp, dtype=jnp.int32))
        ring_p = inv[ring_n]                                          # [M, Fp, K]
        valid = ring_p >= 0
        out2 = conv_face_pooled(out1, jnp.maximum(ring_p, 0), valid, params2, f_tile)
        ph2 = jnp.zeros((M, out2.shape[1], F_total), out2.dtype)
        ph2 = ph2.at[:, :, pool_idx].set(out2)
    else:
        out2 = conv_face(out1, ring_n, None, params2, f_tile)
        ph2 = out2

    return jnp.concatenate([fea, ph2], axis=1)                        # [M, C_in+growth, F_total]


# ----------------------------- pure-JAX reference (mirrors PyTorch exactly) ---

def _conv_face_ref(fea_full, ring_n, pool_idx, params):
    w, b, gamma, beta, rmean, rvar = params
    nb = jax.vmap(lambda f, r: f[:, r])(fea_full, ring_n)             # [M, C, Fp, K]
    fea_p = fea_full[:, :, pool_idx] if pool_idx is not None else fea_full
    s = fea_p + nb.sum(-1)
    y = jnp.einsum('oc,mcf->mof', w, s) + b[None, :, None]
    y = (y - rmean[None, :, None]) / jnp.sqrt(rvar + BN_EPS)[None, :, None]
    y = y * gamma[None, :, None] + beta[None, :, None]
    return jnp.maximum(y, 0.0)


def _conv_face_block_ref(fea, ring_n, pool_idx, params1, params2):
    M, _, F_total = fea.shape
    out1 = _conv_face_ref(fea, ring_n, pool_idx, params1)
    ph1 = (jnp.zeros((M, out1.shape[1], F_total), out1.dtype).at[:, :, pool_idx].set(out1)
           if pool_idx is not None else out1)
    out2 = _conv_face_ref(ph1, ring_n, pool_idx, params2)
    ph2 = (jnp.zeros((M, out2.shape[1], F_total), out2.dtype).at[:, :, pool_idx].set(out2)
           if pool_idx is not None else out2)
    return jnp.concatenate([fea, ph2], axis=1)


# ----------------------------- parameter init --------------------------------

def init_convface_params(key, c_in, c_out):
    """Conv1d(c_in, c_out, 1) + BatchNorm1d(c_out) parameters, deterministic."""
    k = jax.random.split(key, 6)
    w = 0.05 * jax.random.normal(k[0], (c_out, c_in), jnp.float32)    # Conv1d weight[..., 0]
    b = 0.05 * jax.random.normal(k[1], (c_out,), jnp.float32)         # Conv1d bias
    gamma = 1.0 + 0.1 * jax.random.normal(k[2], (c_out,), jnp.float32)
    beta = 0.1 * jax.random.normal(k[3], (c_out,), jnp.float32)
    rmean = 0.1 * jax.random.normal(k[4], (c_out,), jnp.float32)
    rvar = jnp.abs(jax.random.normal(k[5], (c_out,), jnp.float32)) + 0.5
    return (w, b, gamma, beta, rmean, rvar)


# ----------------------------- main -------------------------------------------

if __name__ == "__main__":
    M, C_in, F_total, K = 2, 16, 256, 3          # num_meshes, in_channel, num_faces, num_neighbor
    GROWTH = 32                                   # growth_factor

    key = jax.random.PRNGKey(0)
    kf, kr, k1, k2 = jax.random.split(key, 4)

    fea = jax.random.normal(kf, (M, C_in, F_total), jnp.float32)
    pool_idx = jnp.arange(0, F_total, 2, dtype=jnp.int32)             # num_faces // 2 (unique)
    # ring_n rows correspond to the pooled faces: [M, F_total//2, num_neighbor]
    ring_n = jax.random.randint(kr, (M, pool_idx.shape[0], K), 0, F_total, dtype=jnp.int32)

    params1 = init_convface_params(k1, C_in, 128)    # conv_face_1: in_channel -> 128
    params2 = init_convface_params(k2, 128, GROWTH)  # conv_face_2: 128 -> growth_factor

    out = conv_face_block(fea, ring_n, pool_idx, params1, params2)
    out = jax.block_until_ready(out)

    assert out.shape == (M, C_in + GROWTH, F_total), out.shape
    ref = _conv_face_block_ref(fea, ring_n, pool_idx, params1, params2)
    assert jnp.allclose(out, ref, rtol=1e-4, atol=1e-4), float(jnp.max(jnp.abs(out - ref)))

    print("KERNEL_OK")
</pallas_src>

<mosaic_0001>
module attributes {stable_mosaic.version = 11 : i64} {
  func.func @_convface_mlp_kernel(%arg0: i32, %arg1: memref<16x256xf32, #tpu.memory_space<vmem>>, %arg2: memref<128x16xf32, #tpu.memory_space<vmem>>, %arg3: memref<128x1xf32, #tpu.memory_space<vmem>>, %arg4: memref<128x256xf32, #tpu.memory_space<vmem>>) attributes {dimension_semantics = [#tpu.dimension_semantics<parallel>], iteration_bounds = array<i64: 1>, scalar_prefetch = 0 : i64, scratch_operands = 0 : i64, tpu.core_type = #tpu.core_type<tc>, window_params = [{transform_indices = @transform_0, window_bounds = array<i64: 16, 256>}, {pipeline_mode = #tpu.pipeline_mode<synchronous>, transform_indices = @transform_1, window_bounds = array<i64: 128, 16>}, {pipeline_mode = #tpu.pipeline_mode<synchronous>, transform_indices = @transform_2, window_bounds = array<i64: 128, 1>}, {transform_indices = @transform_3, window_bounds = array<i64: 128, 256>}]} {
    %c0 = arith.constant 0 : index
    %c0_0 = arith.constant 0 : index
    %0 = vector.load %arg2[%c0, %c0_0] : memref<128x16xf32, #tpu.memory_space<vmem>>, vector<128x16xf32>
    %c0_1 = arith.constant 0 : index
    %c0_2 = arith.constant 0 : index
    %1 = vector.load %arg1[%c0_1, %c0_2] : memref<16x256xf32, #tpu.memory_space<vmem>>, vector<16x256xf32>
    %cst = arith.constant dense<0.000000e+00> : vector<128x256xf32>
    %2 = tpu.matmul %0, %1, %cst {dimension_numbers = #tpu.dot_dimension_numbers<[1], [0], [0], [1], [0, 0, 1, 1], [], []>} : vector<128x16xf32>, vector<16x256xf32>, vector<128x256xf32> -> vector<128x256xf32>
    %c0_3 = arith.constant 0 : index
    %c0_4 = arith.constant 0 : index
    %3 = vector.load %arg3[%c0_3, %c0_4] : memref<128x1xf32, #tpu.memory_space<vmem>>, vector<128x1xf32>
    %4 = vector.broadcast %3 : vector<128x1xf32> to vector<128x256xf32>
    %5 = arith.addf %2, %4 : vector<128x256xf32>
    %cst_5 = arith.constant 0.000000e+00 : f32
    %6 = vector.broadcast %cst_5 : f32 to vector<128x256xf32>
    %7 = arith.maximumf %5, %6 : vector<128x256xf32>
    %c0_6 = arith.constant 0 : index
    %c0_7 = arith.constant 0 : index
    %8 = vector.load %arg4[%c0_6, %c0_7] : memref<128x256xf32, #tpu.memory_space<vmem>>, vector<128x256xf32>
    tpu.vector_store %arg4[%c0_6, %c0_7], %7 {strides = array<i32>} : memref<128x256xf32, #tpu.memory_space<vmem>>, vector<128x256xf32>,
    return
  }
  func.func @transform_0(%arg0: i32) -> (i32, i32) {
    %c0_i32 = arith.constant 0 : i32
    %c0_i32_0 = arith.constant 0 : i32
    return %c0_i32, %arg0 : i32, i32
  }
  func.func @transform_1(%arg0: i32) -> (i32, i32) {
    %c0_i32 = arith.constant 0 : i32
    %c0_i32_0 = arith.constant 0 : i32
    %c0_i32_1 = arith.constant 0 : i32
    return %c0_i32, %c0_i32_0 : i32, i32
  }
  func.func @transform_2(%arg0: i32) -> (i32, i32) {
    %c0_i32 = arith.constant 0 : i32
    %c0_i32_0 = arith.constant 0 : i32
    %c0_i32_1 = arith.constant 0 : i32
    return %c0_i32, %c0_i32_0 : i32, i32
  }
  func.func @transform_3(%arg0: i32) -> (i32, i32) {
    %c0_i32 = arith.constant 0 : i32
    %c0_i32_0 = arith.constant 0 : i32
    return %c0_i32, %arg0 : i32, i32
  }
}

</mosaic_0001>

<bundles_post_ra>
// kernel: tpu_custom_call.1
= control target key start
LH: loop header
LB: loop body
LE: loop exit
PB: predicated region body
PF: predicated region fallthrough
CT: control target
= control target key end

     0   :  { %v461_v3 = vmov 0   ;;  %vm131_vm0 = vcmask 130048   ;;  %s644_s0 = inlined_call_operand.vmem [shape: f32[16,256], index: 0, kind: input, shape index: {}]   ;;  %s645_s1 = inlined_call_operand.vmem [shape: f32[128,16], index: 1, kind: input, shape index: {}]   ;;  %s646_s2 = inlined_call_operand.vmem [shape: f32[128,1], index: 2, kind: input, shape index: {}]   ;;  %s647_s3 = inlined_call_operand.hbm [shape: f32[128,256], index: 3, kind: output, shape index: {}]  }
   0x1   :  { %v33_v0 = vld [vmem:[%s644_s0 + $0x10] sm:$0xff]  ;;  %v34_v1 = vld [vmem:[%s644_s0 + $0x18] sm:$0xff]  ;;  %v35_v2 = vld [vmem:[%s646_s2] sm:$0xff]  ;;  %432 = vset.pattern.permute.xlu0 %v461_v3  ;;  %433 = vset.pattern.permute.xlu1 %v461_v3 }
   0x2   :  { %194 = vmatpush.msra.mxu0 %v33_v0  ;;  %v31_v4 = vld [vmem:[%s644_s0] sm:$0xff]  ;;  %424 = vmatpush.msra.mxu2 %v33_v0  ;;  %v32_v5 = vld [vmem:[%s644_s0 + $0x8] sm:$0xff]  ;;  %v37_v8 = vld [vmem:[%s646_s2 + $0x10] sm:$0xff] }
   0x3   :  { %259 = vmatpush.msra.mxu1 %v34_v1  ;;  %426 = vmatpush.msra.mxu3 %v34_v1  ;;  %v15_v6 = vld [vmem:[%s645_s1] sm:$0xff]  ;;  %v36_v10 = vld [vmem:[%s646_s2 + $0x8] sm:$0xff] }
   0x4   :  { %53 = vperm.xlu0 %432, %v35_v2   ;;  %v23_v7 = vld [vmem:[%s645_s1 + $0x40] sm:$0xff]  ;;  %195 = vmatpush.msra.mxu0 %v31_v4 }
   0x5   :  { %425 = vmatpush.msra.mxu2 %v31_v4  ;;  %260 = vmatpush.msra.mxu1 %v32_v5  ;;  %v39_v9 = vld [vmem:[%s646_s2 + $0x20] sm:$0xff] }
   0x6   :  { %427 = vmatpush.msra.mxu3 %v32_v5  ;;  %392 = vmatmul.msk.f32.vlgmr.msra.gmra.mxu0 %vm131_vm0, %v15_v6 }
   0x7   :  { %400 = vmatmul.msk.f32.vlgmr.msra.gmra.mxu2 %vm131_vm0, %v23_v7  ;;  %408 = vmatmul.msk.f32.vlgmr.msra.gmra.mxu1 %vm131_vm0, %v15_v6 }
   0x8   :  { %416 = vmatmul.msk.f32.vlgmr.msra.gmra.mxu3 %vm131_vm0, %v23_v7  ;;  %434 = vset.pattern.permute.xlu2 %v461_v3 }
   0x9   :  { %8 = vsyncpa [#allocation3], 0  ;;  %63 = vperm.xlu1 %433, %v37_v8   ;;  %73 = vperm.xlu2 %434, %v39_v9   ;;  %v16_v11 = vld [vmem:[%s645_s1 + $0x8] sm:$0xff]  ;;  %v38_v13 = vld [vmem:[%s646_s2 + $0x18] sm:$0xff]  ;;  %s380_s29 = sshll.u32 %s647_s3, 4  ;;  %s463_s30 = smov 256   ;;  %s381_s29 = int_to_ptr.hbm [resolvable:$true] %s380_s29 }
   0xa   :  { %v24_v12 = vld [vmem:[%s645_s1 + $0x48] sm:$0xff]  ;;  %v41_v15 = vld [vmem:[%s646_s2 + $0x30] sm:$0xff]  ;;  %v42_v18 = vld [vmem:[%s646_s2 + $0x38] sm:$0xff]  ;;  %s464_s4 = smov 16  }
   0xb   :  { %v40_v14 = vld [vmem:[%s646_s2 + $0x28] sm:$0xff]  ;;  %v17_v16 = vld [vmem:[%s645_s1 + $0x10] sm:$0xff]  ;;  %v43_v19 = vld [vmem:[%s646_s2 + $0x40] sm:$0xff] }
   0xc   :  { %58 = vperm.xlu0 %432, %v36_v10   ;;  %v25_v17 = vld [vmem:[%s645_s1 + $0x50] sm:$0xff]  ;;  %v44_v20 = vld [vmem:[%s646_s2 + $0x48] sm:$0xff]  ;;  %v18_v21 = vld [vmem:[%s645_s1 + $0x18] sm:$0xff] }
   0xd   :  { %v26_v22 = vld [vmem:[%s645_s1 + $0x58] sm:$0xff]  ;;  %v45_v23 = vld [vmem:[%s646_s2 + $0x50] sm:$0xff]  ;;  %v47_v25 = vld [vmem:[%s646_s2 + $0x60] sm:$0xff] }
   0xe   :  { %393 = vmatmul.msk.f32.gmra.mxu0 %vm131_vm0, %v16_v11  ;;  %v46_v24 = vld [vmem:[%s646_s2 + $0x58] sm:$0xff]  ;;  %v19_v26 = vld [vmem:[%s645_s1 + $0x20] sm:$0xff]  ;;  %v48_v28 = vld [vmem:[%s646_s2 + $0x68] sm:$0xff] }
   0xf   :  { %401 = vmatmul.msk.f32.gmra.mxu2 %vm131_vm0, %v24_v12  ;;  %409 = vmatmul.msk.f32.gmra.mxu1 %vm131_vm0, %v16_v11  ;;  %v27_v27 = vld [vmem:[%s645_s1 + $0x60] sm:$0xff]  ;;  %v49_v29 = vld [vmem:[%s646_s2 + $0x70] sm:$0xff]  ;;  %v50_v30 = vld [vmem:[%s646_s2 + $0x78] sm:$0xff] }
  0x10   :  { %417 = vmatmul.msk.f32.gmra.mxu3 %vm131_vm0, %v24_v12  ;;  %v20_v31 = vld [vmem:[%s645_s1 + $0x28] sm:$0xff]  ;;  %v21_v33 = vld [vmem:[%s645_s1 + $0x30] sm:$0xff]  ;;  %v22_v35 = vld [vmem:[%s645_s1 + $0x38] sm:$0xff] }
  0x11   :  { %68 = vperm.xlu1 %433, %v38_v13   ;;  %78 = vperm.xlu2 %434, %v40_v14   ;;  %v28_v32 = vld [vmem:[%s645_s1 + $0x68] sm:$0xff]  ;;  %v29_v34 = vld [vmem:[%s645_s1 + $0x70] sm:$0xff]  ;;  %v30_v36 = vld [vmem:[%s645_s1 + $0x78] sm:$0xff]  ;;  %s462_s1 = smov [#allocation2]  }
  0x12   :  { %s378_s26 = sshll.u32 %s462_s1, 4  ;;  %s379_s26 = int_to_ptr.vmem [resolvable:$true] %s378_s26 }
  0x14   :  { %83 = vperm.xlu0 %432, %v41_v15  }
  0x16   :  { %394 = vmatmul.msk.f32.gmra.mxu0 %vm131_vm0, %v17_v16 }
  0x17   :  { %402 = vmatmul.msk.f32.gmra.mxu2 %vm131_vm0, %v25_v17  ;;  %410 = vmatmul.msk.f32.gmra.mxu1 %vm131_vm0, %v17_v16 }
  0x18   :  { %418 = vmatmul.msk.f32.gmra.mxu3 %vm131_vm0, %v25_v17 }
  0x19   :  { %88 = vperm.xlu1 %433, %v42_v18   ;;  %93 = vperm.xlu2 %434, %v43_v19  }
  0x1c   :  { %98 = vperm.xlu0 %432, %v44_v20  }
  0x1e   :  { %395 = vmatmul.msk.f32.gmra.mxu0 %vm131_vm0, %v18_v21 }
  0x1f   :  { %403 = vmatmul.msk.f32.gmra.mxu2 %vm131_vm0, %v26_v22  ;;  %411 = vmatmul.msk.f32.gmra.mxu1 %vm131_vm0, %v18_v21 }
  0x20   :  { %419 = vmatmul.msk.f32.gmra.mxu3 %vm131_vm0, %v26_v22 }
  0x21   :  { %103 = vperm.xlu1 %433, %v45_v23   ;;  %108 = vperm.xlu2 %434, %v46_v24  }
  0x24   :  { %113 = vperm.xlu0 %432, %v47_v25  }
  0x26   :  { %396 = vmatmul.msk.f32.gmra.mxu0 %vm131_vm0, %v19_v26 }
  0x27   :  { %404 = vmatmul.msk.f32.gmra.mxu2 %vm131_vm0, %v27_v27  ;;  %412 = vmatmul.msk.f32.gmra.mxu1 %vm131_vm0, %v19_v26 }
  0x28   :  { %420 = vmatmul.msk.f32.gmra.mxu3 %vm131_vm0, %v27_v27 }
  0x29   :  { %118 = vperm.xlu1 %433, %v48_v28   ;;  %123 = vperm.xlu2 %434, %v49_v29  }
  0x2c   :  { %128 = vperm.xlu0 %432, %v50_v30  }
  0x2e   :  { %397 = vmatmul.msk.f32.gmra.mxu0 %vm131_vm0, %v20_v31 }
  0x2f   :  { %405 = vmatmul.msk.f32.gmra.mxu2 %vm131_vm0, %v28_v32  ;;  %413 = vmatmul.msk.f32.gmra.mxu1 %vm131_vm0, %v20_v31 }
  0x30   :  { %421 = vmatmul.msk.f32.gmra.mxu3 %vm131_vm0, %v28_v32 }
  0x36   :  { %398 = vmatmul.msk.f32.gmra.mxu0 %vm131_vm0, %v21_v33 }
  0x37   :  { %406 = vmatmul.msk.f32.gmra.mxu2 %vm131_vm0, %v29_v34  ;;  %414 = vmatmul.msk.f32.gmra.mxu1 %vm131_vm0, %v21_v33 }
  0x38   :  { %422 = vmatmul.msk.f32.gmra.mxu3 %vm131_vm0, %v29_v34 }
  0x3e   :  { %399 = vmatmul.msk.f32.gmra.mxu0 %vm131_vm0, %v22_v35 }
  0x3f   :  { %407 = vmatmul.msk.f32.gmra.mxu2 %vm131_vm0, %v30_v36  ;;  %415 = vmatmul.msk.f32.gmra.mxu1 %vm131_vm0, %v22_v35 }
  0x40   :  { %423 = vmatmul.msk.f32.gmra.mxu3 %vm131_vm0, %v30_v36 }
  0x63   :  { %v625_v37 = vpop.permute.xlu2 %73 }
  0x6b   :  { %v627_v41 = vpop.permute.xlu2 %78 }
  0x73   :  { %v94_v50 = vpop.permute.xlu2 %93 }
  0x76   :  { %v54_v38 = vpop.permute.xlu0 %53 }
  0x7b   :  { %v64_v39 = vpop.permute.xlu1 %63  ;;  %v109_v26 = vpop.permute.xlu2 %108 }
  0x7e   :  { %v59_v40 = vpop.permute.xlu0 %58 }
  0x83   :  { %v197_v42 = vpop.f32.mrf.mxu0  ;;  %v69_v43 = vpop.permute.xlu1 %68 }
  0x84   :  { %v198_v44 = vadd.f32 %v197_v42, %v54_v38  ;;  %v262_v45 = vpop.f32.mrf.mxu1 }
  0x85   :  { %v263_v46 = vadd.f32 %v262_v45, %v54_v38 }
  0x86   :  { %v310_v47 = vmax.f32 %v198_v44, 0.0  ;;  %v629_v49 = vpop.permute.xlu0 %83 }
  0x87   :  { %v311_v48 = vmax.f32 %v263_v46, 0.0 }
  0x88   :  { %342 = vst [vmem:[#allocation2] sm:$0xff] %v310_v47 }
  0x89   :  { %343 = vst [vmem:[#allocation2 + $0x8] sm:$0xff] %v311_v48 }
  0x8a   :  { %v221_v51 = vpop.f32.mrf.mxu2 }
  0x8b   :  { %v222_v52 = vadd.f32 %v221_v51, %v94_v50  ;;  %v286_v53 = vpop.f32.mrf.mxu3  ;;  %v200_v55 = vpop.f32.mrf.mxu0 }
  0x8c   :  { %v287_v54 = vadd.f32 %v286_v53, %v94_v50  ;;  %v201_v57 = vadd.f32 %v200_v55, %v59_v40  ;;  %v265_v58 = vpop.f32.mrf.mxu1  ;;  %v631_v61 = vpop.permute.xlu1 %88 }
  0x8d   :  { %v326_v56 = vmax.f32 %v222_v52, 0.0  ;;  %v266_v60 = vadd.f32 %v265_v58, %v59_v40 }
  0x8e   :  { %v327_v59 = vmax.f32 %v287_v54, 0.0  ;;  %v312_v62 = vmax.f32 %v201_v57, 0.0  ;;  %v99_v0 = vpop.permute.xlu0 %98 }
  0x8f   :  { %358 = vst [vmem:[#allocation2 + $0x80] sm:$0xff] %v326_v56  ;;  %v313_v63 = vmax.f32 %v266_v60, 0.0 }
  0x90   :  { %359 = vst [vmem:[#allocation2 + $0x88] sm:$0xff] %v327_v59 }
  0x91   :  { %344 = vst [vmem:[#allocation2 + $0x10] sm:$0xff] %v312_v62 }
  0x92   :  { %345 = vst [vmem:[#allocation2 + $0x18] sm:$0xff] %v313_v63  ;;  %v224_v1 = vpop.f32.mrf.mxu2 }
  0x93   :  { %v225_v2 = vadd.f32 %v224_v1, %v99_v0  ;;  %v289_v3 = vpop.f32.mrf.mxu3  ;;  %v203_v5 = vpop.f32.mrf.mxu0 }
  0x94   :  { %v290_v4 = vadd.f32 %v289_v3, %v99_v0  ;;  %v204_v7 = vadd.f32 %v203_v5, %v64_v39  ;;  %v268_v8 = vpop.f32.mrf.mxu1  ;;  %v104_v13 = vpop.permute.xlu1 %103 }
  0x95   :  { %v328_v6 = vmax.f32 %v225_v2, 0.0  ;;  %v269_v10 = vadd.f32 %v268_v8, %v64_v39  ;;  %v124_v3 = vpop.permute.xlu2 %123 }
  0x96   :  { %v329_v9 = vmax.f32 %v290_v4, 0.0  ;;  %v314_v11 = vmax.f32 %v204_v7, 0.0  ;;  %v114_v40 = vpop.permute.xlu0 %113 }
  0x97   :  { %360 = vst [vmem:[#allocation2 + $0x90] sm:$0xff] %v328_v6  ;;  %v315_v12 = vmax.f32 %v269_v10, 0.0 }
  0x98   :  { %361 = vst [vmem:[#allocation2 + $0x98] sm:$0xff] %v329_v9 }
  0x99   :  { %346 = vst [vmem:[#allocation2 + $0x20] sm:$0xff] %v314_v11 }
  0x9a   :  { %347 = vst [vmem:[#allocation2 + $0x28] sm:$0xff] %v315_v12  ;;  %v227_v14 = vpop.f32.mrf.mxu2 }
  0x9b   :  { %v228_v15 = vadd.f32 %v227_v14, %v104_v13  ;;  %v292_v16 = vpop.f32.mrf.mxu3  ;;  %v206_v18 = vpop.f32.mrf.mxu0 }
  0x9c   :  { %v293_v17 = vadd.f32 %v292_v16, %v104_v13  ;;  %v207_v20 = vadd.f32 %v206_v18, %v69_v43  ;;  %v271_v21 = vpop.f32.mrf.mxu1  ;;  %v119_v54 = vpop.permute.xlu1 %118 }
  0x9d   :  { %v330_v19 = vmax.f32 %v228_v15, 0.0  ;;  %v272_v23 = vadd.f32 %v271_v21, %v69_v43 }
  0x9e   :  { %v331_v22 = vmax.f32 %v293_v17, 0.0  ;;  %v316_v24 = vmax.f32 %v207_v20, 0.0  ;;  %v129_v15 = vpop.permute.xlu0 %128 }
  0x9f   :  { %362 = vst [vmem:[#allocation2 + $0xa0] sm:$0xff] %v330_v19  ;;  %v317_v25 = vmax.f32 %v272_v23, 0.0 }
  0xa0   :  { %363 = vst [vmem:[#allocation2 + $0xa8] sm:$0xff] %v331_v22 }
  0xa1   :  { %348 = vst [vmem:[#allocation2 + $0x30] sm:$0xff] %v316_v24 }
  0xa2   :  { %349 = vst [vmem:[#allocation2 + $0x38] sm:$0xff] %v317_v25  ;;  %v230_v27 = vpop.f32.mrf.mxu2 }
  0xa3   :  { %v231_v28 = vadd.f32 %v230_v27, %v109_v26  ;;  %v295_v29 = vpop.f32.mrf.mxu3  ;;  %v209_v31 = vpop.f32.mrf.mxu0 }
  0xa4   :  { %v296_v30 = vadd.f32 %v295_v29, %v109_v26  ;;  %v210_v33 = vadd.f32 %v209_v31, %v625_v37  ;;  %v274_v34 = vpop.f32.mrf.mxu1 }
  0xa5   :  { %v332_v32 = vmax.f32 %v231_v28, 0.0  ;;  %v275_v36 = vadd.f32 %v274_v34, %v625_v37 }
  0xa6   :  { %v333_v35 = vmax.f32 %v296_v30, 0.0  ;;  %v318_v38 = vmax.f32 %v210_v33, 0.0 }
  0xa7   :  { %364 = vst [vmem:[#allocation2 + $0xb0] sm:$0xff] %v332_v32  ;;  %v319_v39 = vmax.f32 %v275_v36, 0.0 }
  0xa8   :  { %365 = vst [vmem:[#allocation2 + $0xb8] sm:$0xff] %v333_v35 }
  0xa9   :  { %350 = vst [vmem:[#allocation2 + $0x40] sm:$0xff] %v318_v38 }
  0xaa   :  { %351 = vst [vmem:[#allocation2 + $0x48] sm:$0xff] %v319_v39  ;;  %v233_v42 = vpop.f32.mrf.mxu2 }
  0xab   :  { %v234_v43 = vadd.f32 %v233_v42, %v114_v40  ;;  %v298_v44 = vpop.f32.mrf.mxu3  ;;  %v212_v46 = vpop.f32.mrf.mxu0 }
  0xac   :  { %v299_v45 = vadd.f32 %v298_v44, %v114_v40  ;;  %v213_v48 = vadd.f32 %v212_v46, %v627_v41  ;;  %v277_v50 = vpop.f32.mrf.mxu1 }
  0xad   :  { %v334_v47 = vmax.f32 %v234_v43, 0.0  ;;  %v278_v52 = vadd.f32 %v277_v50, %v627_v41 }
  0xae   :  { %v335_v51 = vmax.f32 %v299_v45, 0.0  ;;  %v320_v37 = vmax.f32 %v213_v48, 0.0 }
  0xaf   :  { %366 = vst [vmem:[#allocation2 + $0xc0] sm:$0xff] %v334_v47  ;;  %v321_v53 = vmax.f32 %v278_v52, 0.0 }
  0xb0   :  { %367 = vst [vmem:[#allocation2 + $0xc8] sm:$0xff] %v335_v51 }
  0xb1   :  { %352 = vst [vmem:[#allocation2 + $0x50] sm:$0xff] %v320_v37 }
  0xb2   :  { %353 = vst [vmem:[#allocation2 + $0x58] sm:$0xff] %v321_v53  ;;  %v236_v55 = vpop.f32.mrf.mxu2 }
  0xb3   :  { %v237_v56 = vadd.f32 %v236_v55, %v119_v54  ;;  %v301_v57 = vpop.f32.mrf.mxu3  ;;  %v215_v59 = vpop.f32.mrf.mxu0 }
  0xb4   :  { %v302_v58 = vadd.f32 %v301_v57, %v119_v54  ;;  %v216_v62 = vadd.f32 %v215_v59, %v629_v49  ;;  %v280_v63 = vpop.f32.mrf.mxu1 }
  0xb5   :  { %v336_v60 = vmax.f32 %v237_v56, 0.0  ;;  %v281_v1 = vadd.f32 %v280_v63, %v629_v49 }
  0xb6   :  { %v337_v0 = vmax.f32 %v302_v58, 0.0  ;;  %v322_v41 = vmax.f32 %v216_v62, 0.0 }
  0xb7   :  { %368 = vst [vmem:[#allocation2 + $0xd0] sm:$0xff] %v336_v60  ;;  %v323_v2 = vmax.f32 %v281_v1, 0.0 }
  0xb8   :  { %369 = vst [vmem:[#allocation2 + $0xd8] sm:$0xff] %v337_v0 }
  0xb9   :  { %354 = vst [vmem:[#allocation2 + $0x60] sm:$0xff] %v322_v41 }
  0xba   :  { %355 = vst [vmem:[#allocation2 + $0x68] sm:$0xff] %v323_v2  ;;  %v239_v4 = vpop.f32.mrf.mxu2 }
  0xbb   :  { %v240_v5 = vadd.f32 %v239_v4, %v124_v3  ;;  %v304_v6 = vpop.f32.mrf.mxu3  ;;  %v218_v8 = vpop.f32.mrf.mxu0 }
  0xbc   :  { %v305_v7 = vadd.f32 %v304_v6, %v124_v3  ;;  %v219_v10 = vadd.f32 %v218_v8, %v631_v61  ;;  %v283_v11 = vpop.f32.mrf.mxu1 }
  0xbd   :  { %v338_v9 = vmax.f32 %v240_v5, 0.0  ;;  %v284_v13 = vadd.f32 %v283_v11, %v631_v61 }
  0xbe   :  { %v339_v12 = vmax.f32 %v305_v7, 0.0  ;;  %v324_v49 = vmax.f32 %v219_v10, 0.0 }
  0xbf   :  { %370 = vst [vmem:[#allocation2 + $0xe0] sm:$0xff] %v338_v9  ;;  %v325_v14 = vmax.f32 %v284_v13, 0.0 }
  0xc0   :  { %371 = vst [vmem:[#allocation2 + $0xe8] sm:$0xff] %v339_v12 }
  0xc1   :  { %356 = vst [vmem:[#allocation2 + $0x70] sm:$0xff] %v324_v49 }
  0xc2   :  { %357 = vst [vmem:[#allocation2 + $0x78] sm:$0xff] %v325_v14  ;;  %v242_v16 = vpop.f32.mrf.mxu2 }
  0xc3   :  { %v243_v17 = vadd.f32 %v242_v16, %v129_v15  ;;  %v307_v18 = vpop.f32.mrf.mxu3 }
  0xc4   :  { %v308_v19 = vadd.f32 %v307_v18, %v129_v15 }
  0xc5   :  { %v340_v20 = vmax.f32 %v243_v17, 0.0 }
  0xc6   :  { %v341_v61 = vmax.f32 %v308_v19, 0.0 }
  0xc7   :  { %372 = vst [vmem:[#allocation2 + $0xf0] sm:$0xff] %v340_v20 }
  0xc8   :  { %373 = vst [vmem:[#allocation2 + $0xf8] sm:$0xff] %v341_v61 }
  0xc9   :  { %386 = dma.vmem_to_hbm [thread:$0]  %s379_s26, 4096, %s381_s29, [#allocation3], %s463_s30, %s463_s30, %s464_s4  }
  0xca   :  { %459 = dma.done.wait [#allocation3], 4096  }
  0xcb   :  { %460 = vsyncadd [#allocation3], 4294963200 }
  0xcc   :  { %391 = vsyncpa [#allocation3], 1 }

</bundles_post_ra>
